<compile_context>
chip_gen: v6e
topology: v6e:2x2x1
jax: 0.10.0
libtpu: 0.0.40
codegen_flags: <defaults>
</compile_context>

<pallas_src>
import functools

import jax
import jax.numpy as jnp
from jax.experimental import pallas as pl
from jax.experimental.pallas import tpu as pltpu


# ----------------------------------------------------------------------------
# Glue: deterministic k-means fit (replaces sklearn KMeans in Kmeans_init).
# TODO(synk): sklearn's k-means++ seeding (random_state=0, n_init=10) has no clean
# Pallas/JAX equivalent; we use deterministic evenly-spaced init + Lloyd iterations.
# ----------------------------------------------------------------------------
def _assign_clusters(x, centers):
    # argmin_f |x - c_f|^2 ; drop the per-row |x|^2 term (constant over f).
    # MXU matmul form instead of an (N, F, D) broadcast difference.
    c2 = jnp.sum(centers * centers, axis=1)[None, :]          # (1, F)
    d2 = c2 - 2.0 * (x @ centers.T)                           # (N, F)
    return jnp.argmin(d2, axis=-1)                            # (N,)


def kmeans_init_jax(x, F, iters=10):
    x = x.astype(jnp.float32)
    N, D = x.shape
    init_idx = jnp.arange(F) * (N // F)
    centers = x[init_idx]                                      # (F, D)

    for _ in range(iters):
        labels = _assign_clusters(x, centers)                  # (N,)
        onehot = jax.nn.one_hot(labels, F, dtype=x.dtype)      # (N, F)
        counts = onehot.sum(axis=0)                            # (F,)
        sums = onehot.T @ x                                    # (F, D)
        centers = jnp.where(counts[:, None] > 0,
                            sums / jnp.maximum(counts, 1.0)[:, None],
                            centers)

    # Final assignment -> per-cluster std (population std, like np.std), +1e-5;
    # clusters with <= 1 member get std = 1 (matches Kmeans_init).
    labels = _assign_clusters(x, centers)
    onehot = jax.nn.one_hot(labels, F, dtype=x.dtype)
    counts = onehot.sum(axis=0)
    safe_counts = jnp.maximum(counts, 1.0)[:, None]
    cluster_mean = (onehot.T @ x) / safe_counts
    cluster_ex2 = (onehot.T @ (x * x)) / safe_counts
    var = jnp.maximum(cluster_ex2 - cluster_mean ** 2, 0.0)
    std = jnp.sqrt(var) + 1e-5
    std = jnp.where(counts[:, None] > 1, std, jnp.ones_like(std))
    return centers.astype(jnp.float32), std.astype(jnp.float32)


# ----------------------------------------------------------------------------
# Pallas kernel: fused Gaussian membership + max over fuzzy sets.
#   exp argument per fuzzy set f:  -0.5 * (x - mu_f)^2 / sigma_f^2
#   = (x - mu_f)^2 * neg_half_inv_var_f,  with neg_half_inv_var precomputed (< 0).
#   max_f exp(arg_f) == exp(max_f arg_f)  ->  single exp per element.
# ----------------------------------------------------------------------------
def _membership_kernel(x_ref, mean_ref, nhiv_ref, o_ref, *, num_fuzzy):
    x = x_ref[...]                                   # (tile_rows, d_lanes)
    d = x - mean_ref[0:1, :]
    best = d * d * nhiv_ref[0:1, :]                  # seed with the f=0 term
    for f in range(1, num_fuzzy):                    # F is small & static -> unrolled
        d = x - mean_ref[f:f + 1, :]
        best = jnp.maximum(best, d * d * nhiv_ref[f:f + 1, :])
    o_ref[...] = jnp.exp(best)                       # one transcendental per element


def max_gaussian_membership(x, means, stds, target_tile_rows=512):
    N, D = x.shape
    F = means.shape[0]
    orig_dtype = x.dtype

    xf = x.astype(jnp.float32)
    means = means.astype(jnp.float32)
    neg_half_inv_var = -0.5 / (stds.astype(jnp.float32) ** 2)   # (F, D), hoisted divide

    # ---- lane-dense packing: fold `pack` consecutive rows into the 128-lane dim ----
    pack = 128 // D if (D < 128 and 128 % D == 0) else 1
    n_pad = (-N) % pack
    if n_pad:
        xf = jnp.pad(xf, ((0, n_pad), (0, 0)))
    rows = xf.shape[0] // pack
    d_lanes = D * pack

    x2 = xf.reshape(rows, d_lanes)
    mu2 = jnp.tile(means, (1, pack))                  # (F, d_lanes)
    nhiv2 = jnp.tile(neg_half_inv_var, (1, pack))     # (F, d_lanes)

    # ---- tile sizing: big tiles amortize per-step overhead; pad rows instead of asserting ----
    tile_rows = min(target_tile_rows, rows)
    if tile_rows < rows:
        tile_rows = max(8, (tile_rows // 8) * 8)      # keep sublane alignment
    row_pad = (-rows) % tile_rows
    if row_pad:
        x2 = jnp.pad(x2, ((0, row_pad), (0, 0)))
    rows_p = x2.shape[0]

    kernel = functools.partial(_membership_kernel, num_fuzzy=F)
    out2 = pl.pallas_call(
        kernel,
        out_shape=jax.ShapeDtypeStruct((rows_p, d_lanes), jnp.float32),
        grid=(rows_p // tile_rows,),
        in_specs=[
            pl.BlockSpec((tile_rows, d_lanes), lambda i: (i, 0)),   # x tile (lane-dense)
            pl.BlockSpec((F, d_lanes), lambda i: (0, 0)),           # means (resident)
            pl.BlockSpec((F, d_lanes), lambda i: (0, 0)),           # -0.5/sigma^2 (resident)
        ],
        out_specs=pl.BlockSpec((tile_rows, d_lanes), lambda i: (i, 0)),
        compiler_params=pltpu.CompilerParams(
            dimension_semantics=("parallel",)),
    )(x2, mu2, nhiv2)

    out = out2.reshape(rows_p * pack, D)[:N]
    return out.astype(orig_dtype)


# ----------------------------------------------------------------------------
# FGCNNLayer forward
# ----------------------------------------------------------------------------
def fgcnn_layer_forward(x, fussy):
    means, stds = kmeans_init_jax(x, fussy)              # glue (data-dependent "init")
    m_ship = max_gaussian_membership(x, means, stds)     # Pallas hot path
    return m_ship


if __name__ == "__main__":
    key = jax.random.PRNGKey(0)
    N, D, F = 128, 32, 4                 # small shapes: 128 samples, 32 features, 4 fuzzy sets
    x = jax.random.normal(key, (N, D), dtype=jnp.float32)

    out = fgcnn_layer_forward(x, F)
    out = jax.block_until_ready(out)

    # Reference check in plain JAX (same means/stds, membership + max over F).
    means, stds = kmeans_init_jax(x, F)
    memb_ref = jnp.exp(-((x[:, None, :] - means[None, :, :]) ** 2)
                       / (2.0 * stds[None, :, :] ** 2))       # (N, F, D)
    ref = jnp.max(memb_ref, axis=1)                           # (N, D)

    assert out.shape == (N, D)
    assert jnp.allclose(out, ref, atol=1e-5, rtol=1e-5)
    print("KERNEL_OK")
</pallas_src>

<mosaic_0001>
module attributes {stable_mosaic.version = 11 : i64} {
  func.func @_membership_kernel(%arg0: i32, %arg1: memref<32x128xf32, #tpu.memory_space<vmem>>, %arg2: memref<4x128xf32, #tpu.memory_space<vmem>>, %arg3: memref<4x128xf32, #tpu.memory_space<vmem>>, %arg4: memref<32x128xf32, #tpu.memory_space<vmem>>) attributes {dimension_semantics = [#tpu.dimension_semantics<parallel>], iteration_bounds = array<i64: 1>, scalar_prefetch = 0 : i64, scratch_operands = 0 : i64, tpu.core_type = #tpu.core_type<tc>, window_params = [{transform_indices = @transform_0, window_bounds = array<i64: 32, 128>}, {pipeline_mode = #tpu.pipeline_mode<synchronous>, transform_indices = @transform_1, window_bounds = array<i64: 4, 128>}, {pipeline_mode = #tpu.pipeline_mode<synchronous>, transform_indices = @transform_2, window_bounds = array<i64: 4, 128>}, {transform_indices = @transform_3, window_bounds = array<i64: 32, 128>}]} {
    %c0 = arith.constant 0 : index
    %c0_0 = arith.constant 0 : index
    %0 = vector.load %arg1[%c0, %c0_0] : memref<32x128xf32, #tpu.memory_space<vmem>>, vector<32x128xf32>
    %c0_1 = arith.constant 0 : index
    %c0_2 = arith.constant 0 : index
    %1 = vector.load %arg2[%c0_1, %c0_2] : memref<4x128xf32, #tpu.memory_space<vmem>>, vector<1x128xf32>
    %2 = vector.broadcast %1 : vector<1x128xf32> to vector<32x128xf32>
    %3 = arith.subf %0, %2 : vector<32x128xf32>
    %4 = arith.mulf %3, %3 : vector<32x128xf32>
    %c0_3 = arith.constant 0 : index
    %c0_4 = arith.constant 0 : index
    %5 = vector.load %arg3[%c0_3, %c0_4] : memref<4x128xf32, #tpu.memory_space<vmem>>, vector<1x128xf32>
    %6 = vector.broadcast %5 : vector<1x128xf32> to vector<32x128xf32>
    %7 = arith.mulf %4, %6 : vector<32x128xf32>
    %c1 = arith.constant 1 : index
    %c0_5 = arith.constant 0 : index
    %8 = vector.load %arg2[%c1, %c0_5] : memref<4x128xf32, #tpu.memory_space<vmem>>, vector<1x128xf32>
    %9 = vector.broadcast %8 : vector<1x128xf32> to vector<32x128xf32>
    %10 = arith.subf %0, %9 : vector<32x128xf32>
    %11 = arith.mulf %10, %10 : vector<32x128xf32>
    %c1_6 = arith.constant 1 : index
    %c0_7 = arith.constant 0 : index
    %12 = vector.load %arg3[%c1_6, %c0_7] : memref<4x128xf32, #tpu.memory_space<vmem>>, vector<1x128xf32>
    %13 = vector.broadcast %12 : vector<1x128xf32> to vector<32x128xf32>
    %14 = arith.mulf %11, %13 : vector<32x128xf32>
    %15 = arith.maximumf %7, %14 : vector<32x128xf32>
    %c2 = arith.constant 2 : index
    %c0_8 = arith.constant 0 : index
    %16 = vector.load %arg2[%c2, %c0_8] : memref<4x128xf32, #tpu.memory_space<vmem>>, vector<1x128xf32>
    %17 = vector.broadcast %16 : vector<1x128xf32> to vector<32x128xf32>
    %18 = arith.subf %0, %17 : vector<32x128xf32>
    %19 = arith.mulf %18, %18 : vector<32x128xf32>
    %c2_9 = arith.constant 2 : index
    %c0_10 = arith.constant 0 : index
    %20 = vector.load %arg3[%c2_9, %c0_10] : memref<4x128xf32, #tpu.memory_space<vmem>>, vector<1x128xf32>
    %21 = vector.broadcast %20 : vector<1x128xf32> to vector<32x128xf32>
    %22 = arith.mulf %19, %21 : vector<32x128xf32>
    %23 = arith.maximumf %15, %22 : vector<32x128xf32>
    %c3 = arith.constant 3 : index
    %c0_11 = arith.constant 0 : index
    %24 = vector.load %arg2[%c3, %c0_11] : memref<4x128xf32, #tpu.memory_space<vmem>>, vector<1x128xf32>
    %25 = vector.broadcast %24 : vector<1x128xf32> to vector<32x128xf32>
    %26 = arith.subf %0, %25 : vector<32x128xf32>
    %27 = arith.mulf %26, %26 : vector<32x128xf32>
    %c3_12 = arith.constant 3 : index
    %c0_13 = arith.constant 0 : index
    %28 = vector.load %arg3[%c3_12, %c0_13] : memref<4x128xf32, #tpu.memory_space<vmem>>, vector<1x128xf32>
    %29 = vector.broadcast %28 : vector<1x128xf32> to vector<32x128xf32>
    %30 = arith.mulf %27, %29 : vector<32x128xf32>
    %31 = arith.maximumf %23, %30 : vector<32x128xf32>
    %32 = math.exp %31 : vector<32x128xf32>
    %c0_14 = arith.constant 0 : index
    %c0_15 = arith.constant 0 : index
    %33 = vector.load %arg4[%c0_14, %c0_15] : memref<32x128xf32, #tpu.memory_space<vmem>>, vector<32x128xf32>
    tpu.vector_store %arg4[%c0_14, %c0_15], %32 {strides = array<i32>} : memref<32x128xf32, #tpu.memory_space<vmem>>, vector<32x128xf32>,
    return
  }
  func.func @transform_0(%arg0: i32) -> (i32, i32) {
    %c0_i32 = arith.constant 0 : i32
    %c0_i32_0 = arith.constant 0 : i32
    return %arg0, %c0_i32 : i32, i32
  }
  func.func @transform_1(%arg0: i32) -> (i32, i32) {
    %c0_i32 = arith.constant 0 : i32
    %c0_i32_0 = arith.constant 0 : i32
    %c0_i32_1 = arith.constant 0 : i32
    return %c0_i32, %c0_i32_0 : i32, i32
  }
  func.func @transform_2(%arg0: i32) -> (i32, i32) {
    %c0_i32 = arith.constant 0 : i32
    %c0_i32_0 = arith.constant 0 : i32
    %c0_i32_1 = arith.constant 0 : i32
    return %c0_i32, %c0_i32_0 : i32, i32
  }
  func.func @transform_3(%arg0: i32) -> (i32, i32) {
    %c0_i32 = arith.constant 0 : i32
    %c0_i32_0 = arith.constant 0 : i32
    return %arg0, %c0_i32 : i32, i32
  }
}

</mosaic_0001>

<bundles_post_ra>
// kernel: tpu_custom_call.1
= control target key start
LH: loop header
LB: loop body
LE: loop exit
PB: predicated region body
PF: predicated region fallthrough
CT: control target
= control target key end

     0   :  { %8 = vsyncpa [#allocation3], 0  ;;  %s338_s0 = inlined_call_operand.hbm [shape: f32[32,128], index: 0, kind: input, shape index: {}]   ;;  %s339_s1 = inlined_call_operand.hbm [shape: f32[4,128], index: 1, kind: input, shape index: {}]   ;;  %s340_s2 = inlined_call_operand.hbm [shape: f32[4,128], index: 2, kind: input, shape index: {}]   ;;  %s341_s3 = inlined_call_operand.hbm [shape: f32[32,128], index: 3, kind: output, shape index: {}]  }
   0x1   :  { %9 = vsyncpa [#allocation6], 0 }
   0x2   :  { %10 = vsyncpa [#allocation4], 0  ;;  %s294_s12 = smov [#allocation5]   ;;  %s295_s14 = smov [#allocation2]  }
   0x3   :  { %s29_s13 = sshll.u32 %s294_s12, 4  ;;  %s16_s15 = sshll.u32 %s295_s14, 4  ;;  %s30_s13 = int_to_ptr.vmem [resolvable:$true] %s29_s13  ;;  %s17_s15 = int_to_ptr.vmem [resolvable:$true] %s16_s15 }
   0x4   :  { %s216_s16 = scalar_lea.vmem %s30_s13, 64  ;;  %p221_p1 = scmp.lt.s32.totalorder %s30_s13, %s30_s13 }
   0x5   :  { %p217_p0 = scmp.ne.s32.totalorder %s30_s13, %s216_s16  ;;  %p222_p2 = scmp.lt.s32.totalorder %s216_s16, %s216_s16 }
   0x7   :  { %p223_p3 = por %p222_p2, %p221_p1 }
   0x9   :  { %p224_p4 = pnand %p223_p3, %p217_p0 }
   0xb   :  { %227 = shalt.err (!%p224_p4)
}
   0xc   :  { %32 = dma.hbm_to_vmem [thread:$0]  %s339_s1, 64, %s30_s13, [#allocation6]  }
   0xd   :  { %s236_s19 = scalar_lea.vmem %s17_s15, 512  ;;  %p241_p6 = scmp.lt.s32.totalorder %s17_s15, %s17_s15 }
   0xe   :  { %p237_p5 = scmp.ne.s32.totalorder %s17_s15, %s236_s19  ;;  %p242_p7 = scmp.lt.s32.totalorder %s236_s19, %s236_s19 }
  0x10   :  { %p243_p8 = por %p242_p7, %p241_p6 }
  0x12   :  { %p244_p9 = pnand %p243_p8, %p237_p5 }
  0x14   :  { %247 = shalt.err (!%p244_p9)
}
  0x15   :  { %s296_s20 = smov 128   ;;  %s297_s21 = smov 8  }
  0x16   :  { %22 = dma.hbm_to_vmem [thread:$0]  %s338_s0, 512, %s17_s15, [#allocation3], %s296_s20, %s296_s20, %s297_s21  }
  0x17   :  { %s298_s24 = smov [#allocation7]  }
  0x18   :  { %s39_s25 = sshll.u32 %s298_s24, 4  ;;  %s40_s25 = int_to_ptr.vmem [resolvable:$true] %s39_s25 }
  0x19   :  { %s256_s1 = scalar_lea.vmem %s40_s25, 64  ;;  %p261_p11 = scmp.lt.s32.totalorder %s40_s25, %s40_s25 }
  0x1a   :  { %p257_p10 = scmp.ne.s32.totalorder %s40_s25, %s256_s1  ;;  %p262_p12 = scmp.lt.s32.totalorder %s256_s1, %s256_s1 }
  0x1c   :  { %p263_p13 = por %p262_p12, %p261_p11 }
  0x1e   :  { %p264_p0 = pnand %p263_p13, %p257_p10 }
  0x20   :  { %267 = shalt.err (!%p264_p0)
}
  0x21   :  { %42 = dma.hbm_to_vmem [thread:$0]  %s340_s2, 64, %s40_s25, [#allocation6]  }
  0x22   :  { %288 = dma.done.wait [#allocation3], 512  }
  0x23   :  { %289 = vsyncadd [#allocation3], 4294966784 }
  0x24   :  { %290 = dma.done.wait [#allocation6], 128  }
  0x25   :  { %291 = vsyncadd [#allocation6], 4294967168  ;;  %v52_v0 = vld [vmem:[#allocation2] sm:$0xff]  ;;  %v53_v13 = vld [vmem:[#allocation2 + $0x8] sm:$0xff]  ;;  %s299_s0 = smov [#allocation8]  }
  0x26   :  { %v186_v1 = vld [vmem:[#allocation5] ss:$0 sm:$0xff]  ;;  %v188_v3 = vld [vmem:[#allocation5 + $0x1] ss:$0 sm:$0xff]  ;;  %v190_v4 = vld [vmem:[#allocation5 + $0x2] ss:$0 sm:$0xff] }
  0x27   :  { %v61_v2 = vsub.f32 %v52_v0, %v186_v1  ;;  %v187_v5 = vld [vmem:[#allocation7] ss:$0 sm:$0xff]  ;;  %v83_v6 = vsub.f32 %v52_v0, %v188_v3  ;;  %v109_v7 = vsub.f32 %v52_v0, %v190_v4  ;;  %v192_v8 = vld [vmem:[#allocation5 + $0x3] ss:$0 sm:$0xff]  ;;  %v189_v10 = vld [vmem:[#allocation7 + $0x1] ss:$0 sm:$0xff]  ;;  %v62_v17 = vsub.f32 %v53_v13, %v186_v1 }
  0x28   :  { %v191_v11 = vld [vmem:[#allocation7 + $0x2] ss:$0 sm:$0xff]  ;;  %v135_v12 = vsub.f32 %v52_v0, %v192_v8  ;;  %v193_v16 = vld [vmem:[#allocation7 + $0x3] ss:$0 sm:$0xff]  ;;  %v84_v18 = vsub.f32 %v53_v13, %v188_v3  ;;  %v54_v19 = vld [vmem:[#allocation2 + $0x10] sm:$0xff]  ;;  %v110_v22 = vsub.f32 %v53_v13, %v190_v4  ;;  %v136_v23 = vsub.f32 %v53_v13, %v192_v8  ;;  %s173_s2 = sshll.u32 %s299_s0, 4  ;;  %s174_s2 = int_to_ptr.vmem [resolvable:$true] %s173_s2 }
  0x29   :  { %v65_v9 = vmul.f32 %v61_v2, %v61_v2  ;;  %v87_v14 = vmul.f32 %v83_v6, %v83_v6  ;;  %v113_v15 = vmul.f32 %v109_v7, %v109_v7  ;;  %v66_v26 = vmul.f32 %v62_v17, %v62_v17  ;;  %v55_v36 = vld [vmem:[#allocation2 + $0x18] sm:$0xff]  ;;  %s268_s28 = scalar_lea.vmem %s174_s2, 512  ;;  %p273_p2 = scmp.lt.s32.totalorder %s174_s2, %s174_s2 }
  0x2a   :  { %v139_v21 = vmul.f32 %v135_v12, %v135_v12  ;;  %v88_v27 = vmul.f32 %v84_v18, %v84_v18  ;;  %v114_v29 = vmul.f32 %v110_v22, %v110_v22  ;;  %v140_v30 = vmul.f32 %v136_v23, %v136_v23  ;;  %p269_p1 = scmp.ne.s32.totalorder %s174_s2, %s268_s28  ;;  %p274_p3 = scmp.lt.s32.totalorder %s268_s28, %s268_s28 }
  0x2b   :  { %v74_v20 = vmul.f32 %v187_v5, %v65_v9  ;;  %v96_v24 = vmul.f32 %v189_v10, %v87_v14  ;;  %v122_v25 = vmul.f32 %v191_v11, %v113_v15  ;;  %v63_v31 = vsub.f32 %v54_v19, %v186_v1 }
  0x2c   :  { %v148_v28 = vmul.f32 %v193_v16, %v139_v21  ;;  %v75_v33 = vmul.f32 %v187_v5, %v66_v26  ;;  %v97_v34 = vmul.f32 %v189_v10, %v88_v27  ;;  %v85_v35 = vsub.f32 %v54_v19, %v188_v3  ;;  %p275_p4 = por %p274_p3, %p273_p2 }
  0x2d   :  { %v100_v32 = vmax.f32 %v74_v20, %v96_v24  ;;  %v123_v37 = vmul.f32 %v191_v11, %v114_v29  ;;  %v149_v38 = vmul.f32 %v193_v16, %v140_v30  ;;  %v67_v39 = vmul.f32 %v63_v31, %v63_v31 }
  0x2e   :  { %v111_v40 = vsub.f32 %v54_v19, %v190_v4  ;;  %v101_v42 = vmax.f32 %v75_v33, %v97_v34  ;;  %v89_v43 = vmul.f32 %v85_v35, %v85_v35  ;;  %v137_v44 = vsub.f32 %v54_v19, %v192_v8  ;;  %p276_p5 = pnand %p275_p4, %p269_p1 }
  0x2f   :  { %v126_v41 = vmax.f32 %v100_v32, %v122_v25  ;;  %v76_v45 = vmul.f32 %v187_v5, %v67_v39  ;;  %v64_v47 = vsub.f32 %v55_v36, %v186_v1  ;;  %v86_v48 = vsub.f32 %v55_v36, %v188_v3 }
  0x30   :  { %v115_v46 = vmul.f32 %v111_v40, %v111_v40  ;;  %v127_v50 = vmax.f32 %v101_v42, %v123_v37  ;;  %v98_v51 = vmul.f32 %v189_v10, %v89_v43  ;;  %v141_v52 = vmul.f32 %v137_v44, %v137_v44 }
  0x31   :  { %v152_v49 = vmax.f32 %v126_v41, %v148_v28  ;;  %v68_v54 = vmul.f32 %v64_v47, %v64_v47  ;;  %v90_v55 = vmul.f32 %v86_v48, %v86_v48  ;;  %v112_v56 = vsub.f32 %v55_v36, %v190_v4 }
  0x32   :  { %v124_v53 = vmul.f32 %v191_v11, %v115_v46  ;;  %v153_v58 = vmax.f32 %v127_v50, %v149_v38  ;;  %v102_v59 = vmax.f32 %v76_v45, %v98_v51  ;;  %v150_v60 = vmul.f32 %v193_v16, %v141_v52 }
  0x33   :  { %v156_v57 = vmul.f32 1.442695, %v152_v49  ;;  %v77_v61 = vmul.f32 %v187_v5, %v68_v54  ;;  %v99_v62 = vmul.f32 %v189_v10, %v90_v55  ;;  %v116_v63 = vmul.f32 %v112_v56, %v112_v56 }
  0x34   :  { %v138_v0 = vsub.f32 %v55_v36, %v192_v8  ;;  %v158_v2 = vmul.f32 1.442695, %v153_v58  ;;  %v128_v1 = vmax.f32 %v102_v59, %v124_v53 }
  0x35   :  { %200 = vpow2.f32 %v156_v57  ;;  %v103_v3 = vmax.f32 %v77_v61, %v99_v62  ;;  %v125_v6 = vmul.f32 %v191_v11, %v116_v63 }
  0x36   :  { %v142_v7 = vmul.f32 %v138_v0, %v138_v0  ;;  %202 = vpow2.f32 %v158_v2  ;;  %v154_v9 = vmax.f32 %v128_v1, %v150_v60 }
  0x37   :  { %v129_v12 = vmax.f32 %v103_v3, %v125_v6 }
  0x38   :  { %v151_v13 = vmul.f32 %v193_v16, %v142_v7  ;;  %v160_v14 = vmul.f32 1.442695, %v154_v9 }
  0x3a   :  { %v155_v4 = vmax.f32 %v129_v12, %v151_v13  ;;  %204 = vpow2.f32 %v160_v14 }
  0x3c   :  { %v162_v15 = vmul.f32 1.442695, %v155_v4 }
  0x3e   :  { %206 = vpow2.f32 %v162_v15 }
  0x42   :  { %v201_v17 = vpop.eup %200 }
  0x43   :  { %164 = vst [vmem:[#allocation8] sm:$0xff] %v201_v17  ;;  %v203_v5 = vpop.eup %202 }
  0x44   :  { %165 = vst [vmem:[#allocation8 + $0x8] sm:$0xff] %v203_v5 }
  0x47   :  { %v205_v8 = vpop.eup %204 }
  0x48   :  { %166 = vst [vmem:[#allocation8 + $0x10] sm:$0xff] %v205_v8 }
  0x4b   :  { %v207_v10 = vpop.eup %206 }
  0x4c   :  { %167 = vst [vmem:[#allocation8 + $0x18] sm:$0xff] %v207_v10 }
  0x4d   :  { %279 = shalt.err (!%p276_p5)
}
  0x4e   :  { %179 = dma.vmem_to_hbm [thread:$0]  %s174_s2, 512, %s341_s3, [#allocation4], %s296_s20, %s296_s20, %s297_s21  }
  0x4f   :  { %292 = dma.done.wait [#allocation4], 512  }
  0x50   :  { %293 = vsyncadd [#allocation4], 4294966784 }
  0x51   :  { %183 = vsyncpa [#allocation3], 1 }
  0x52   :  { %184 = vsyncpa [#allocation6], 1 }
  0x53   :  { %185 = vsyncpa [#allocation4], 1 }

</bundles_post_ra>
